<compile_context>
chip_gen: v5e
topology: v5e:2x2
jax: 0.10.0
libtpu: 0.0.40
codegen_flags: <defaults>
</compile_context>

<pallas_src>
import functools

import jax
import jax.numpy as jnp
from jax import lax
from jax.experimental import pallas as pl
from jax.experimental.pallas import tpu as pltpu


def _gender_classifier_kernel(params_ref, x_ref, o_ref):
    # params_ref: SMEM (17,) f32, scalar-prefetched:
    #   [0:8)   w1 (2,4) row-major: w1[i, j] at i*4 + j
    #   [8:12)  b1 (4,)
    #   [12:16) dw2[j] = w2[j,1] - w2[j,0]
    #   [16]    db2    = b2[1]   - b2[0]
    # x_ref / o_ref: VMEM (TR, W) f32, natural row-major view of (B, 2):
    #   lane 2c holds feature-0 of a sample, lane 2c+1 holds feature-1 of it.
    v = x_ref[...]
    W = v.shape[-1]

    lane = lax.broadcasted_iota(jnp.int32, v.shape, 1)
    even = (lane & 1) == 0

    # Pair-swap de-interleave on the XLU: bring each lane's partner feature
    # alongside it.  Rolls are cyclic, but even lanes only consume the right
    # neighbour and odd lanes only the left one, so wraparound never leaks.
    left_nb = pltpu.roll(v, W - 1, 1)    # lane c <- v[c + 1]
    right_nb = pltpu.roll(v, 1, 1)       # lane c <- v[c - 1]
    x0 = jnp.where(even, v, right_nb)    # feature 0 of this lane's sample
    x1 = jnp.where(even, left_nb, v)     # feature 1 of this lane's sample

    # Linear(2,4) + ReLU fused straight into the logit-difference accumulator:
    #   d = db2 + sum_j dw2[j] * relu(w1[0,j]*x0 + w1[1,j]*x1 + b1[j])
    d = jnp.full_like(v, params_ref[16])
    for j in range(4):
        hj = jnp.maximum(
            params_ref[j] * x0 + params_ref[4 + j] * x1 + params_ref[8 + j], 0.0)
        d = d + params_ref[12 + j] * hj

    # Softmax over 2 classes == sigmoid of the logit difference (no XLU reduce).
    # Clamp so exp() can't reach inf (keeps the Newton step NaN-free);
    # sigmoid(+-80) already saturates to 0/1 in f32, so this is exact.
    d = jnp.clip(d, -80.0, 80.0)
    a = 1.0 + jnp.exp(d)                 # EUP
    r = pl.reciprocal(a, approx=True)    # EUP (free slot)
    r = r * (2.0 - a * r)                # one Newton step -> f32-exact p0
    # Even lanes hold p0, odd lanes p1 = 1 - p0 -> output is already in the
    # interleaved row-major (B, 2) layout; no wrapper transpose on the way out.
    o_ref[...] = jnp.where(even, r, 1.0 - r)


@functools.partial(jax.jit, static_argnames=("lane_width", "block_rows"))
def gender_classifier(x, w1, b1, w2, b2, *, lane_width=1024, block_rows=256):
    """Forward pass of GenderClassifier.

    x : (B, 2) float32
    w1: (2, 4), b1: (4,)  -- Linear(2, 4) in (in, out) layout
    w2: (4, 2), b2: (2,)  -- Linear(4, 2) in (in, out) layout
    Returns (B, 2) softmax probabilities.

    lane_width : lane extent of a block (multiple of 128; 2 lanes per sample).
    block_rows : sublane extent of a block (multiple of 8).  Default block is
                 (256, 1024) f32 = 1 MiB per input/output block.
    """
    B = x.shape[0]
    assert x.shape[1] == 2
    assert lane_width % 128 == 0
    assert block_rows % 8 == 0

    # Pack the 17 needed scalars (layer 1 + logit-difference form of layer 2).
    dw2 = w2[:, 1] - w2[:, 0]
    db2 = b2[1] - b2[0]
    params = jnp.concatenate(
        [w1.reshape(-1), b1.reshape(-1), dw2.reshape(-1), db2.reshape(1)]
    ).astype(jnp.float32)

    # View the row-major (B, 2) input as (rows, lane_width): 2 lanes per sample,
    # batch running along lanes then sublanes.  Only a tail zero-pad is needed
    # (no transpose); padded samples compute garbage-free values and are sliced
    # off at the end.
    spr = lane_width // 2                       # samples per row
    rows = pl.cdiv(B, spr)
    if rows >= block_rows:
        tr = block_rows
        rows = pl.cdiv(rows, tr) * tr           # whole number of blocks
    else:
        tr = rows                               # single short block (full extent)
    b_pad = rows * spr

    xf = x.astype(jnp.float32)
    if b_pad != B:
        xf = jnp.pad(xf, ((0, b_pad - B), (0, 0)))
    xr = xf.reshape(rows, lane_width)

    out_r = pl.pallas_call(
        _gender_classifier_kernel,
        out_shape=jax.ShapeDtypeStruct((rows, lane_width), jnp.float32),
        grid_spec=pltpu.PrefetchScalarGridSpec(
            num_scalar_prefetch=1,              # params -> SMEM once, before grid
            grid=(rows // tr,),
            in_specs=[pl.BlockSpec((tr, lane_width), lambda i, p: (i, 0))],
            out_specs=pl.BlockSpec((tr, lane_width), lambda i, p: (i, 0)),
        ),
        compiler_params=pltpu.CompilerParams(
            # Batch tiles are independent -> shard across v7x's 2 TCs; neutral
            # on single-TC v5e/v6e.
            dimension_semantics=("parallel",),
            vmem_limit_bytes=32 * 1024 * 1024,
        ),
    )(params, xr)

    out = out_r.reshape(b_pad, 2)
    return out[:B] if b_pad != B else out


def init_params(key):
    """Parameter init mirroring nn.Linear shapes (stored as (out, in) then
    transposed to the kernel's (in, out) layout); biases kept 1-D."""
    k1, k2, k3, k4 = jax.random.split(key, 4)
    w1_t = jax.random.uniform(k1, (4, 2), jnp.float32, minval=-0.5, maxval=0.5)
    b1 = jax.random.uniform(k2, (4,), jnp.float32, minval=-0.5, maxval=0.5)
    w2_t = jax.random.uniform(k3, (2, 4), jnp.float32, minval=-0.5, maxval=0.5)
    b2 = jax.random.uniform(k4, (2,), jnp.float32, minval=-0.5, maxval=0.5)
    return w1_t.T, b1, w2_t.T, b2   # (2,4), (4,), (4,2), (2,)


def reference(x, w1, b1, w2, b2):
    h = jnp.maximum(x @ w1 + b1, 0.0)
    logits = h @ w2 + b2
    return jax.nn.softmax(logits, axis=1)


if __name__ == "__main__":
    key = jax.random.PRNGKey(0)
    k_x, k_x2, k_p = jax.random.split(key, 3)
    w1, b1, w2, b2 = init_params(k_p)

    # Small batch (matches the original usage): single short block, grid=(1,).
    B = 8
    x = jax.random.normal(k_x, (B, 2), jnp.float32)
    out = jax.block_until_ready(gender_classifier(x, w1, b1, w2, b2))
    ref = reference(x, w1, b1, w2, b2)
    assert out.shape == (B, 2)
    assert jnp.allclose(out, ref, atol=1e-5, rtol=1e-5)
    assert jnp.allclose(jnp.sum(out, axis=1), jnp.ones((B,)), atol=1e-5)

    # Non-multiple batch with small blocks: exercises tail padding, a multi-step
    # grid (rows=16, tr=8 -> grid=(2,)) and the "parallel" batch axis.
    B2 = 1000
    x2 = jax.random.normal(k_x2, (B2, 2), jnp.float32)
    out2 = jax.block_until_ready(
        gender_classifier(x2, w1, b1, w2, b2, lane_width=128, block_rows=8))
    ref2 = reference(x2, w1, b1, w2, b2)
    assert out2.shape == (B2, 2)
    assert jnp.allclose(out2, ref2, atol=1e-5, rtol=1e-5)
    assert jnp.allclose(jnp.sum(out2, axis=1), jnp.ones((B2,)), atol=1e-5)

    print("KERNEL_OK")
</pallas_src>

<mosaic_0001>
module attributes {stable_mosaic.version = 11 : i64} {
  func.func @_gender_classifier_kernel(%arg0: i32, %arg1: memref<17xf32, #tpu.memory_space<smem>>, %arg2: memref<1x1024xf32, #tpu.memory_space<vmem>>, %arg3: memref<1x1024xf32, #tpu.memory_space<vmem>>) attributes {dimension_semantics = [#tpu.dimension_semantics<parallel>], iteration_bounds = array<i64: 1>, scalar_prefetch = 1 : i64, scratch_operands = 0 : i64, tpu.core_type = #tpu.core_type<tc>, window_params = [{transform_indices = @transform_0, window_bounds = array<i64: 1, 1024>}, {transform_indices = @transform_1, window_bounds = array<i64: 1, 1024>}]} {
    %c0 = arith.constant 0 : index
    %c0_0 = arith.constant 0 : index
    %0 = vector.load %arg2[%c0, %c0_0] : memref<1x1024xf32, #tpu.memory_space<vmem>>, vector<1x1024xf32>
    %1 = tpu.iota {dimensions = array<i32: 1>} : vector<1x1024xi32>
    %c1_i32 = arith.constant 1 : i32
    %2 = vector.broadcast %c1_i32 : i32 to vector<1x1024xi32>
    %3 = arith.andi %1, %2 : vector<1x1024xi32>
    %c0_i32 = arith.constant 0 : i32
    %4 = vector.broadcast %c0_i32 : i32 to vector<1x1024xi32>
    %5 = arith.cmpi eq, %3, %4 : vector<1x1024xi32>
    %c1023_i32 = arith.constant 1023 : i32
    %6 = tpu.dynamic_rotate %0 by %c1023_i32 dim 1 : vector<1x1024xf32>, i32 -> vector<1x1024xf32>
    %c1_i32_1 = arith.constant 1 : i32
    %7 = tpu.dynamic_rotate %0 by %c1_i32_1 dim 1 : vector<1x1024xf32>, i32 -> vector<1x1024xf32>
    %8 = arith.select %5, %0, %7 : vector<1x1024xi1>, vector<1x1024xf32>
    %9 = arith.select %5, %6, %0 : vector<1x1024xi1>, vector<1x1024xf32>
    %c16 = arith.constant 16 : index
    %10 = memref.load %arg1[%c16] : memref<17xf32, #tpu.memory_space<smem>>
    %11 = vector.broadcast %10 : f32 to vector<1x1024xf32>
    %c0_2 = arith.constant 0 : index
    %12 = memref.load %arg1[%c0_2] : memref<17xf32, #tpu.memory_space<smem>>
    %13 = vector.broadcast %12 : f32 to vector<1x1024xf32>
    %14 = arith.mulf %13, %8 : vector<1x1024xf32>
    %c4 = arith.constant 4 : index
    %15 = memref.load %arg1[%c4] : memref<17xf32, #tpu.memory_space<smem>>
    %16 = vector.broadcast %15 : f32 to vector<1x1024xf32>
    %17 = arith.mulf %16, %9 : vector<1x1024xf32>
    %18 = arith.addf %14, %17 : vector<1x1024xf32>
    %c8 = arith.constant 8 : index
    %19 = memref.load %arg1[%c8] : memref<17xf32, #tpu.memory_space<smem>>
    %20 = vector.broadcast %19 : f32 to vector<1x1024xf32>
    %21 = arith.addf %18, %20 : vector<1x1024xf32>
    %cst = arith.constant 0.000000e+00 : f32
    %22 = vector.broadcast %cst : f32 to vector<1x1024xf32>
    %23 = arith.maximumf %21, %22 : vector<1x1024xf32>
    %c12 = arith.constant 12 : index
    %24 = memref.load %arg1[%c12] : memref<17xf32, #tpu.memory_space<smem>>
    %25 = vector.broadcast %24 : f32 to vector<1x1024xf32>
    %26 = arith.mulf %25, %23 : vector<1x1024xf32>
    %27 = arith.addf %11, %26 : vector<1x1024xf32>
    %c1 = arith.constant 1 : index
    %28 = memref.load %arg1[%c1] : memref<17xf32, #tpu.memory_space<smem>>
    %29 = vector.broadcast %28 : f32 to vector<1x1024xf32>
    %30 = arith.mulf %29, %8 : vector<1x1024xf32>
    %c5 = arith.constant 5 : index
    %31 = memref.load %arg1[%c5] : memref<17xf32, #tpu.memory_space<smem>>
    %32 = vector.broadcast %31 : f32 to vector<1x1024xf32>
    %33 = arith.mulf %32, %9 : vector<1x1024xf32>
    %34 = arith.addf %30, %33 : vector<1x1024xf32>
    %c9 = arith.constant 9 : index
    %35 = memref.load %arg1[%c9] : memref<17xf32, #tpu.memory_space<smem>>
    %36 = vector.broadcast %35 : f32 to vector<1x1024xf32>
    %37 = arith.addf %34, %36 : vector<1x1024xf32>
    %cst_3 = arith.constant 0.000000e+00 : f32
    %38 = vector.broadcast %cst_3 : f32 to vector<1x1024xf32>
    %39 = arith.maximumf %37, %38 : vector<1x1024xf32>
    %c13 = arith.constant 13 : index
    %40 = memref.load %arg1[%c13] : memref<17xf32, #tpu.memory_space<smem>>
    %41 = vector.broadcast %40 : f32 to vector<1x1024xf32>
    %42 = arith.mulf %41, %39 : vector<1x1024xf32>
    %43 = arith.addf %27, %42 : vector<1x1024xf32>
    %c2 = arith.constant 2 : index
    %44 = memref.load %arg1[%c2] : memref<17xf32, #tpu.memory_space<smem>>
    %45 = vector.broadcast %44 : f32 to vector<1x1024xf32>
    %46 = arith.mulf %45, %8 : vector<1x1024xf32>
    %c6 = arith.constant 6 : index
    %47 = memref.load %arg1[%c6] : memref<17xf32, #tpu.memory_space<smem>>
    %48 = vector.broadcast %47 : f32 to vector<1x1024xf32>
    %49 = arith.mulf %48, %9 : vector<1x1024xf32>
    %50 = arith.addf %46, %49 : vector<1x1024xf32>
    %c10 = arith.constant 10 : index
    %51 = memref.load %arg1[%c10] : memref<17xf32, #tpu.memory_space<smem>>
    %52 = vector.broadcast %51 : f32 to vector<1x1024xf32>
    %53 = arith.addf %50, %52 : vector<1x1024xf32>
    %cst_4 = arith.constant 0.000000e+00 : f32
    %54 = vector.broadcast %cst_4 : f32 to vector<1x1024xf32>
    %55 = arith.maximumf %53, %54 : vector<1x1024xf32>
    %c14 = arith.constant 14 : index
    %56 = memref.load %arg1[%c14] : memref<17xf32, #tpu.memory_space<smem>>
    %57 = vector.broadcast %56 : f32 to vector<1x1024xf32>
    %58 = arith.mulf %57, %55 : vector<1x1024xf32>
    %59 = arith.addf %43, %58 : vector<1x1024xf32>
    %c3 = arith.constant 3 : index
    %60 = memref.load %arg1[%c3] : memref<17xf32, #tpu.memory_space<smem>>
    %61 = vector.broadcast %60 : f32 to vector<1x1024xf32>
    %62 = arith.mulf %61, %8 : vector<1x1024xf32>
    %c7 = arith.constant 7 : index
    %63 = memref.load %arg1[%c7] : memref<17xf32, #tpu.memory_space<smem>>
    %64 = vector.broadcast %63 : f32 to vector<1x1024xf32>
    %65 = arith.mulf %64, %9 : vector<1x1024xf32>
    %66 = arith.addf %62, %65 : vector<1x1024xf32>
    %c11 = arith.constant 11 : index
    %67 = memref.load %arg1[%c11] : memref<17xf32, #tpu.memory_space<smem>>
    %68 = vector.broadcast %67 : f32 to vector<1x1024xf32>
    %69 = arith.addf %66, %68 : vector<1x1024xf32>
    %cst_5 = arith.constant 0.000000e+00 : f32
    %70 = vector.broadcast %cst_5 : f32 to vector<1x1024xf32>
    %71 = arith.maximumf %69, %70 : vector<1x1024xf32>
    %c15 = arith.constant 15 : index
    %72 = memref.load %arg1[%c15] : memref<17xf32, #tpu.memory_space<smem>>
    %73 = vector.broadcast %72 : f32 to vector<1x1024xf32>
    %74 = arith.mulf %73, %71 : vector<1x1024xf32>
    %75 = arith.addf %59, %74 : vector<1x1024xf32>
    %cst_6 = arith.constant -8.000000e+01 : f32
    %cst_7 = arith.constant 8.000000e+01 : f32
    %76 = vector.broadcast %cst_6 : f32 to vector<1x1024xf32>
    %77 = arith.maximumf %76, %75 : vector<1x1024xf32>
    %78 = vector.broadcast %cst_7 : f32 to vector<1x1024xf32>
    %79 = arith.minimumf %78, %77 : vector<1x1024xf32>
    %80 = math.exp %79 : vector<1x1024xf32>
    %cst_8 = arith.constant 1.000000e+00 : f32
    %81 = vector.broadcast %cst_8 : f32 to vector<1x1024xf32>
    %82 = arith.addf %81, %80 : vector<1x1024xf32>
    %83 = tpu.reciprocal %82 {approx = true} : vector<1x1024xf32> -> vector<1x1024xf32>
    %84 = arith.mulf %82, %83 : vector<1x1024xf32>
    %cst_9 = arith.constant 2.000000e+00 : f32
    %85 = vector.broadcast %cst_9 : f32 to vector<1x1024xf32>
    %86 = arith.subf %85, %84 : vector<1x1024xf32>
    %87 = arith.mulf %83, %86 : vector<1x1024xf32>
    %cst_10 = arith.constant 1.000000e+00 : f32
    %88 = vector.broadcast %cst_10 : f32 to vector<1x1024xf32>
    %89 = arith.subf %88, %87 : vector<1x1024xf32>
    %90 = arith.select %5, %87, %89 : vector<1x1024xi1>, vector<1x1024xf32>
    %c0_11 = arith.constant 0 : index
    %c0_12 = arith.constant 0 : index
    %91 = vector.load %arg3[%c0_11, %c0_12] : memref<1x1024xf32, #tpu.memory_space<vmem>>, vector<1x1024xf32>
    tpu.vector_store %arg3[%c0_11, %c0_12], %90 {strides = array<i32>} : memref<1x1024xf32, #tpu.memory_space<vmem>>, vector<1x1024xf32>,
    return
  }
  func.func @transform_0(%arg0: i32, %arg1: memref<17xf32, #tpu.memory_space<smem>>) -> (i32, i32) {
    %c0_i32 = arith.constant 0 : i32
    %c0_i32_0 = arith.constant 0 : i32
    return %arg0, %c0_i32 : i32, i32
  }
  func.func @transform_1(%arg0: i32, %arg1: memref<17xf32, #tpu.memory_space<smem>>) -> (i32, i32) {
    %c0_i32 = arith.constant 0 : i32
    %c0_i32_0 = arith.constant 0 : i32
    return %arg0, %c0_i32 : i32, i32
  }
}

</mosaic_0001>

<bundles_post_ra>
// kernel: gender_classifier.1
= control target key start
LH: loop header
LB: loop body
LE: loop exit
PB: predicated region body
PF: predicated region fallthrough
CT: control target
= control target key end

     0   :  { %s580_s12 = smov [#allocation3]   ;;  %s1088_s0 = inlined_call_operand.vmem [shape: f32[17], index: 0, kind: input, shape index: {}]   ;;  %s1089_s1 = inlined_call_operand.vmem [shape: f32[1,1024], index: 1, kind: input, shape index: {}]   ;;  %s1090_s2 = inlined_call_operand.vmem [shape: f32[1,1024], index: 2, kind: output, shape index: {}]  }
   0x1   :  { %s8_s11 = sshll.u32 %s1088_s0, 4  ;;  %s9_s11 = int_to_ptr.vmem [resolvable:$true] %s8_s11 }
   0x2   :  { %11 = dma.vmem_to_smem %s9_s11, 16, %s580_s12, [#allocation2] }
   0x3   :  { %578 = dma.done.wait [#allocation2], 16 }
   0x4   :  { %579 = vsyncadd [#allocation2], 4294967280 }
   0x5   :  { %14 = sfence }
   0x6   :  { %v17_v0 = vld [vmem:[%s1089_s1] sm:$0xff]  ;;  %s581_s15 = smov 127   ;;  %s582_s0 = smov 1   ;;  %v18_v10 = vlaneseq  ;;  %v1115_v39 = vmov 0  ;;  %v1118_v40 = vmov 0  ;;  %v1121_v41 = vmov 0 }
   0x7   :  { %v604_v1 = vperm.slane %v17_v0, 2  ;;  %v606_v2 = vperm.slane %v17_v0, 0  ;;  %v608_v3 = vperm.slane %v17_v0, 4  ;;  %v613_v4 = vperm.slane %v17_v0, 3  ;;  %s642_s1 = sld [smem:[#allocation3 + $0x4]] }
   0x8   :  { %v615_v5 = vperm.slane %v17_v0, 1  ;;  %v617_v6 = vperm.slane %v17_v0, 5  ;;  %v622_v7 = vperm.slane %v17_v0, 7  ;;  %v624_v8 = vperm.slane %v17_v0, 6  ;;  %s646_s16 = sld [smem:[#allocation3 + $0x5]] }
   0x9   :  { %1109 = vst [vmem:[#allocation5_spill] sm:$0xff] %v606_v2  ;;  %64 = vrot.lane.b32.xlu1 %v604_v1, %s581_s15  ;;  %60 = vrot.lane.b32.xlu0 %v606_v2, %s581_s15  ;;  %v644_v13 = vand.u32 127, %v18_v10  ;;  %s648_s17 = sld [smem:[#allocation3 + $0x6]]  ;;  %v1124_v42 = vmov 0  ;;  %v1127_v58 = vmov 0  ;;  %vm489_vm10 = vcmask 1042434  }
   0xa   :  { %68 = vrot.lane.b32.xlu2 %v608_v3, %s581_s15  ;;  %1110 = vst [vmem:[#allocation6_spill] sm:$0xff] %v622_v7  ;;  %s652_s18 = sld [smem:[#allocation3 + $0x7]]  ;;  %vm487_vm11 = vcmask 1040384   ;;  %vm493_vm12 = vcmask 1044484   ;;  %vm491_vm13 = vcmask 1041408   ;;  %vm495_vm14 = vcmask 1046534  }
   0xb   :  { %s654_s19 = sld [smem:[#allocation3]]  ;;  %v23_v15 = vadd.s32 512, %v644_v13  ;;  %v21_v16 = vadd.s32 256, %v644_v13  ;;  %v22_v20 = vadd.s32 384, %v644_v13  ;;  %vm76_vm0 = vcmp.lt.s32.totalorder %v644_v13, 127 }
   0xc   :  { %s657_s20 = sld [smem:[#allocation3 + $0x10]]  ;;  %v20_v21 = vadd.s32 128, %v644_v13  ;;  %v27_v27 = vand.u32 1, %v644_v13  ;;  %v26_v29 = vadd.s32 896, %v644_v13  ;;  %v24_v30 = vadd.s32 640, %v644_v13 }
   0xd   :  { %s659_s21 = sld [smem:[#allocation3 + $0x8]]  ;;  %v31_v19 = vand.u32 1, %v23_v15  ;;  %v29_v22 = vand.u32 1, %v21_v16  ;;  %v30_v26 = vand.u32 1, %v22_v20  ;;  %v25_v31 = vadd.s32 768, %v644_v13 }
   0xe   :  { %s661_s22 = sld [smem:[#allocation3 + $0xc]]  ;;  %v28_v28 = vand.u32 1, %v20_v21  ;;  %v696_v32 = vstv %s642_s1  ;;  %v701_v33 = vstv %s646_s16  ;;  %vm726_vm4 = vcmp.eq.s32.totalorder %v27_v27, 0 }
   0xf   :  { %s664_s23 = sld [smem:[#allocation3 + $0x1]]  ;;  %vm679_vm1 = vcmp.eq.s32.totalorder %v31_v19, 0  ;;  %1114 = vst [vmem:[#allocation8_spill] sm:$0xff] %v701_v33  ;;  %v704_v34 = vstv %s648_s17  ;;  %vm718_vm2 = vcmp.eq.s32.totalorder %v29_v22, 0  ;;  %vm722_vm3 = vcmp.eq.s32.totalorder %v30_v26, 0 }
  0x10   :  { %s667_s24 = sld [smem:[#allocation3 + $0x9]]  ;;  %v707_v35 = vstv %s652_s18  ;;  %v1116_v39 = vsel %vm718_vm2, 4294967295, %v1115_v39  ;;  %v1119_v40 = vsel %vm722_vm3, 4294967295, %v1118_v40  ;;  %v1122_v41 = vsel %vm726_vm4, 4294967295, %v1121_v41 }
  0x11   :  { %66 = vrot.lane.b32.xlu1 %v613_v4, %s581_s15  ;;  %62 = vrot.lane.b32.xlu0 %v615_v5, %s581_s15  ;;  %s671_s25 = sld [smem:[#allocation3 + $0xd]]  ;;  %1117 = vst [vmem:[#allocation9_spill] sm:$0xff] %v1116_v39  ;;  %vm730_vm5 = vcmp.eq.s32.totalorder %v28_v28, 0  ;;  %v34_v43 = vand.u32 1, %v26_v29  ;;  %v32_v44 = vand.u32 1, %v24_v30  ;;  %v33_v45 = vand.u32 1, %v25_v31 }
  0x12   :  { %70 = vrot.lane.b32.xlu2 %v617_v6, %s581_s15  ;;  %s673_s26 = sld [smem:[#allocation3 + $0x2]]  ;;  %1120 = vst [vmem:[#allocation10_spill] sm:$0xff] %v1119_v40  ;;  %v1125_v42 = vsel %vm730_vm5, 4294967295, %v1124_v42  ;;  %vm101_vm6 = vcmp.lt.s32.totalorder %v644_v13, 1  ;;  %v748_v50 = vstv %s657_s20  ;;  %v751_v51 = vstv %s654_s19 }
  0x13   :  { %s677_s27 = sld [smem:[#allocation3 + $0xa]]  ;;  %1123 = vst [vmem:[#allocation11_spill] sm:$0xff] %v1122_v41  ;;  %v754_v52 = vstv %s659_s21  ;;  %vm771_vm7 = vcmp.eq.s32.totalorder %v34_v43, 0  ;;  %vm789_vm8 = vcmp.eq.s32.totalorder %v32_v44, 0  ;;  %vm817_vm9 = vcmp.eq.s32.totalorder %v33_v45, 0 }
  0x14   :  { %s688_s28 = sld [smem:[#allocation3 + $0xe]]  ;;  %1126 = vst [vmem:[#allocation12_spill] sm:$0xff] %v1125_v42  ;;  %v763_v55 = vstv %s661_s22  ;;  %v1128_v58 = vsel %vm771_vm7, 4294967295, %v1127_v58  ;;  %v1132_v22 = vmov 0  ;;  %vm497_vm15 = vcmask 1045508  }
  0x15   :  { %s693_s29 = sld [smem:[#allocation3 + $0x3]]  ;;  %v766_v56 = vstv %s664_s23  ;;  %1129 = vst [vmem:[#allocation13_spill] sm:$0xff] %v1128_v58  ;;  %v1133_v22 = vsel %vm817_vm9, 4294967295, %v1132_v22 }
  0x16   :  { %s698_s30 = sld [smem:[#allocation3 + $0xb]]  ;;  %v776_v59 = vstv %s667_s24  ;;  %1134 = vst [vmem:[#allocation14_spill] sm:$0xff] %v1133_v22 }
  0x17   :  { %s716_s3 = sld [smem:[#allocation3 + $0xf]]  ;;  %v779_v60 = vstv %s671_s25 }
  0x18   :  { %v782_v61 = vstv %s673_s26 }
  0x19   :  { %74 = vrot.lane.b32.xlu1 %v622_v7, %s581_s15  ;;  %72 = vrot.lane.b32.xlu0 %v624_v8, %s581_s15 }
  0x1a   :  { %85 = vrot.lane.b32.xlu2 %v606_v2, %s582_s0  ;;  %v797_v10 = vstv %s688_s28 }
  0x1d   :  { %v812_v19 = vstv %s716_s3 }
  0x21   :  { %89 = vrot.lane.b32.xlu1 %v604_v1, %s582_s0  ;;  %87 = vrot.lane.b32.xlu0 %v615_v5, %s582_s0 }
  0x22   :  { %91 = vrot.lane.b32.xlu2 %v613_v4, %s582_s0 }
  0x29   :  { %95 = vrot.lane.b32.xlu1 %v617_v6, %s582_s0  ;;  %93 = vrot.lane.b32.xlu0 %v608_v3, %s582_s0 }
  0x2a   :  { %97 = vrot.lane.b32.xlu2 %v624_v8, %s582_s0 }
  0x31   :  { %99 = vrot.lane.b32.xlu0 %v622_v7, %s582_s0 }
  0x64   :  { %v636_v9 = vpop.permute.xlu2 %68 }
  0x6c   :  { %v650_v14 = vpop.permute.xlu2 %70 }
  0x6d   :  { %v79_v25 = vsel %vm76_vm0, %v636_v9, %v650_v14 }
  0x6e   :  { %v122_v36 = vsel %vm679_vm1, %v79_v25, %v608_v3 }
  0x6f   :  { %v735_v46 = vmul.f32 %v696_v32, %v122_v36  ;;  %v738_v47 = vmul.f32 %v701_v33, %v122_v36  ;;  %v741_v48 = vmul.f32 %v704_v34, %v122_v36  ;;  %v744_v49 = vmul.f32 %v707_v35, %v122_v36 }
  0x74   :  { %v675_v23 = vpop.permute.xlu2 %85 }
  0x75   :  { %1111 = vst [vmem:[#allocation7_spill] sm:$0xff] %v675_v23 }
  0x7b   :  { %v638_v11 = vpop.permute.xlu1 %64  ;;  %v640_v12 = vpop.permute.xlu0 %60 }
  0x7c   :  { %v784_v62 = vpop.permute.xlu2 %91 }
  0x83   :  { %v67_v17 = vpop.permute.xlu1 %66  ;;  %v63_v18 = vpop.permute.xlu0 %62 }
  0x84   :  { %v80_v53 = vsel %vm76_vm0, %v67_v17, %v636_v9  ;;  %v81_v54 = vsel %vm76_vm0, %v638_v11, %v67_v17  ;;  %v82_v57 = vsel %vm76_vm0, %v63_v18, %v638_v11  ;;  %v83_v63 = vsel %vm76_vm0, %v640_v12, %v63_v18 }
  0x85   :  { %v794_v9 = vstv %s677_s27  ;;  %v800_v11 = vstv %s693_s29  ;;  %v120_v15 = vsel %vm718_vm2, %v81_v54, %v604_v1  ;;  %v121_v16 = vsel %vm722_vm3, %v80_v53, %v613_v4 }
  0x86   :  { %v809_v18 = vstv %s698_s30  ;;  %v119_v21 = vsel %vm730_vm5, %v82_v57, %v615_v5  ;;  %v832_v28 = vsel %vm726_vm4, %v83_v63, %v606_v2  ;;  %v142_v36 = vmul.f32 %v696_v32, %v120_v15 }
  0x87   :  { %1135 = vst [vmem:[#allocation15_spill] sm:$0xff] %v832_v28  ;;  %v143_v43 = vmul.f32 %v696_v32, %v121_v16  ;;  %v207_v53 = vmul.f32 %v701_v33, %v121_v16  ;;  %v206_v57 = vmul.f32 %v701_v33, %v120_v15  ;;  %v271_v63 = vmul.f32 %v704_v34, %v121_v16 }
  0x88   :  { %v334_v39 = vmul.f32 %v707_v35, %v120_v15 }
  0x8b   :  { %v712_v37 = vpop.permute.xlu1 %74  ;;  %v714_v38 = vpop.permute.xlu0 %72 }
  0x8c   :  { %v78_v42 = vsel %vm76_vm0, %v650_v14, %v714_v38  ;;  %v77_v14 = vsel %vm76_vm0, %v714_v38, %v712_v37 }
  0x93   :  { %v90_v17 = vpop.permute.xlu1 %89  ;;  %v88_v20 = vpop.permute.xlu0 %87 }
  0x94   :  { %v106_v25 = vsel %vm101_vm6, %v90_v17, %v784_v62  ;;  %v107_v26 = vsel %vm101_vm6, %v88_v20, %v90_v17  ;;  %v108_v27 = vsel %vm101_vm6, %v675_v23, %v88_v20  ;;  %v84_v20 = vsel %vm76_vm0, %v712_v37, %v640_v12 }
  0x95   :  { %v113_v29 = vsel %vm722_vm3, %v613_v4, %v106_v25  ;;  %v111_v30 = vsel %vm730_vm5, %v615_v5, %v108_v27  ;;  %v112_v31 = vsel %vm718_vm2, %v604_v1, %v107_v26  ;;  %v141_v4 = vmul.f32 %v696_v32, %v119_v21 }
  0x96   :  { %v133_v44 = vmul.f32 %v751_v51, %v113_v29  ;;  %v197_v45 = vmul.f32 %v766_v56, %v113_v29  ;;  %v131_v54 = vmul.f32 %v751_v51, %v111_v30  ;;  %v132_v5 = vmul.f32 %v751_v51, %v112_v31 }
  0x97   :  { %v270_v1 = vmul.f32 %v704_v34, %v120_v15  ;;  %v261_v26 = vmul.f32 %v782_v61, %v113_v29  ;;  %v195_v12 = vmul.f32 %v766_v56, %v111_v30  ;;  %v872_v15 = vsel %vm771_vm7, %v84_v20, %v622_v7 }
  0x98   :  { %v151_v17 = vadd.f32 %v143_v43, %v133_v44  ;;  %v215_v25 = vadd.f32 %v207_v53, %v197_v45  ;;  %v149_v27 = vadd.f32 %v141_v4, %v131_v54  ;;  %v150_v41 = vadd.f32 %v142_v36, %v132_v5  ;;  %1136 = vst [vmem:[#allocation16_spill] sm:$0xff] %v872_v15 }
  0x99   :  { %v335_v43 = vmul.f32 %v707_v35, %v121_v16  ;;  %v205_v44 = vmul.f32 %v701_v33, %v119_v21  ;;  %v196_v45 = vmul.f32 %v766_v56, %v112_v31  ;;  %v325_v36 = vmul.f32 %v800_v11, %v113_v29  ;;  %v891_v29 = vpop.permute.xlu2 %97 }
  0x9a   :  { %v161_v40 = vadd.f32 %v754_v52, %v151_v17  ;;  %v123_v16 = vsel %vm789_vm8, %v78_v42, %v617_v6  ;;  %v225_v4 = vadd.f32 %v776_v59, %v215_v25  ;;  %v279_v54 = vadd.f32 %v271_v63, %v261_v26  ;;  %1138 = vst [vmem:[#allocation18_spill] sm:$0xff] %v891_v29 }
  0x9b   :  { %v159_v5 = vadd.f32 %v754_v52, %v149_v27  ;;  %v886_v17 = vmul.f32 %v696_v32, %v832_v28  ;;  %v269_v20 = vmul.f32 %v704_v34, %v119_v21  ;;  %v333_v37 = vmul.f32 %v707_v35, %v119_v21 }
  0x9c   :  { %v169_v53 = vmax.f32 %v161_v40, 0.0  ;;  %v160_v38 = vadd.f32 %v754_v52, %v150_v41  ;;  %v96_v40 = vpop.permute.xlu1 %95  ;;  %v124_v42 = vsel %vm817_vm9, %v77_v14, %v624_v8  ;;  %v213_v25 = vadd.f32 %v205_v44, %v195_v12 }
  0x9d   :  { %1137 = vst [vmem:[#allocation17_spill] sm:$0xff] %v886_v17  ;;  %v214_v26 = vadd.f32 %v206_v57, %v196_v45  ;;  %v899_v27 = vmul.f32 %v696_v32, %v872_v15  ;;  %v902_v28 = vmul.f32 %v696_v32, %v123_v16  ;;  %v343_v21 = vadd.f32 %v335_v43, %v325_v36 }
  0x9e   :  { %v179_v63 = vmul.f32 %v763_v55, %v169_v53  ;;  %v259_v41 = vmul.f32 %v782_v61, %v111_v30  ;;  %v233_v17 = vmax.f32 %v225_v4, 0.0  ;;  %v289_v58 = vadd.f32 %v794_v9, %v279_v54 }
  0x9f   :  { %1139 = vst [vmem:[#allocation19_spill] sm:$0xff] %v899_v27  ;;  %v167_v7 = vmax.f32 %v159_v5, 0.0  ;;  %v103_v14 = vsel %vm101_vm6, %v96_v40, %v891_v29  ;;  %v146_v57 = vmul.f32 %v696_v32, %v124_v42  ;;  %v911_v44 = vmul.f32 %v701_v33, %v123_v16 }
  0xa0   :  { %v168_v12 = vmax.f32 %v160_v38, 0.0  ;;  %v260_v45 = vmul.f32 %v782_v61, %v112_v31  ;;  %v187_v43 = vadd.f32 %v179_v63, %v748_v50  ;;  %v223_v53 = vadd.f32 %v776_v59, %v213_v25 }
  0xa1   :  { %v224_v36 = vadd.f32 %v776_v59, %v214_v26  ;;  %v920_v4 = vsel %vm817_vm9, %v624_v8, %v103_v14  ;;  %v353_v54 = vadd.f32 %v809_v18, %v343_v21  ;;  %v277_v32 = vadd.f32 %v269_v20, %v259_v41 }
  0xa2   :  { %v323_v5 = vmul.f32 %v800_v11, %v111_v30  ;;  %v324_v38 = vmul.f32 %v800_v11, %v112_v31  ;;  %v243_v15 = vmul.f32 %v779_v60, %v233_v17  ;;  %v297_v27 = vmax.f32 %v289_v58, 0.0 }
  0xa3   :  { %v177_v63 = vmul.f32 %v763_v55, %v167_v7  ;;  %v136_v25 = vmul.f32 %v751_v51, %v920_v4  ;;  %v210_v26 = vmul.f32 %v701_v33, %v124_v42  ;;  %v931_v8 = vmul.f32 %v704_v34, %v123_v16 }
  0xa4   :  { %v178_v21 = vmul.f32 %v763_v55, %v168_v12  ;;  %v278_v20 = vadd.f32 %v270_v1, %v260_v45  ;;  %v274_v30 = vmul.f32 %v704_v34, %v124_v42  ;;  %v251_v41 = vadd.f32 %v243_v15, %v187_v43  ;;  %v94_v12 = vpop.permute.xlu0 %93 }
  0xa5   :  { %v231_v31 = vmax.f32 %v223_v53, 0.0  ;;  %v232_v14 = vmax.f32 %v224_v36, 0.0  ;;  %v936_v58 = vmul.f32 %v707_v35, %v123_v16  ;;  %v287_v7 = vadd.f32 %v794_v9, %v277_v32 }
  0xa6   :  { %v341_v17 = vadd.f32 %v333_v37, %v323_v5  ;;  %v342_v22 = vadd.f32 %v334_v39, %v324_v38  ;;  %v307_v33 = vmul.f32 %v797_v10, %v297_v27  ;;  %v361_v2 = vmax.f32 %v353_v54, 0.0 }
  0xa7   :  { %v185_v23 = vadd.f32 %v177_v63, %v748_v50  ;;  %v154_v29 = vadd.f32 %v146_v57, %v136_v25  ;;  %v338_v1 = vmul.f32 %v707_v35, %v124_v42  ;;  %v186_v15 = vadd.f32 %v178_v21, %v748_v50 }
  0xa8   :  { %v288_v45 = vadd.f32 %v794_v9, %v278_v20  ;;  %v200_v16 = vmul.f32 %v766_v56, %v920_v4  ;;  %v315_v43 = vadd.f32 %v307_v33, %v251_v41  ;;  %v241_v37 = vmul.f32 %v779_v60, %v231_v31 }
  0xa9   :  { %v242_v39 = vmul.f32 %v779_v60, %v232_v14  ;;  %v264_v27 = vmul.f32 %v782_v61, %v920_v4  ;;  %v295_v53 = vmax.f32 %v287_v7, 0.0  ;;  %v351_v57 = vadd.f32 %v809_v18, %v341_v17 }
  0xaa   :  { %v352_v42 = vadd.f32 %v809_v18, %v342_v22  ;;  %v104_v36 = vsel %vm101_vm6, %v94_v12, %v96_v40  ;;  %v371_v54 = vmul.f32 %v812_v19, %v361_v2  ;;  %v249_v32 = vadd.f32 %v241_v37, %v185_v23 }
  0xab   :  { %v164_v33 = vadd.f32 %v754_v52, %v154_v29  ;;  %v105_v5 = vsel %vm101_vm6, %v784_v62, %v94_v12  ;;  %v250_v38 = vadd.f32 %v242_v39, %v186_v15  ;;  %v296_v63 = vmax.f32 %v288_v45, 0.0 }
  0xac   :  { %v218_v25 = vadd.f32 %v210_v26, %v200_v16  ;;  %v114_v21 = vsel %vm679_vm1, %v608_v3, %v105_v5  ;;  %v962_v22 = vadd.f32 %v371_v54, %v315_v43  ;;  %v282_v20 = vadd.f32 %v274_v30, %v264_v27 }
  0xad   :  { %v115_v2 = vsel %vm789_vm8, %v617_v6, %v104_v36  ;;  %v134_v23 = vmul.f32 %v751_v51, %v114_v21  ;;  %v305_v40 = vmul.f32 %v797_v10, %v295_v53  ;;  %v359_v29 = vmax.f32 %v351_v57, 0.0 }
  0xae   :  { %v360_v62 = vmax.f32 %v352_v42, 0.0  ;;  %v135_v41 = vmul.f32 %v751_v51, %v115_v2  ;;  %v172_v26 = vmax.f32 %v164_v33, 0.0  ;;  %v198_v3 = vmul.f32 %v766_v56, %v114_v21 }
  0xaf   :  { %v152_v31 = vadd.f32 %v735_v46, %v134_v23  ;;  %v199_v14 = vmul.f32 %v766_v56, %v115_v2  ;;  %v306_v30 = vmul.f32 %v797_v10, %v296_v63  ;;  %v228_v7 = vadd.f32 %v776_v59, %v218_v25 }
  0xb0   :  { %v153_v6 = vadd.f32 %v902_v28, %v135_v41  ;;  %v262_v17 = vmul.f32 %v782_v61, %v114_v21  ;;  %v313_v12 = vadd.f32 %v305_v40, %v249_v32  ;;  %v292_v15 = vadd.f32 %v794_v9, %v282_v20 }
  0xb1   :  { %v328_v45 = vmul.f32 %v800_v11, %v920_v4  ;;  %v162_v46 = vadd.f32 %v754_v52, %v152_v31  ;;  %v216_v43 = vadd.f32 %v738_v47, %v198_v3  ;;  %v217_v37 = vadd.f32 %v911_v44, %v199_v14 }
  0xb2   :  { %v163_v16 = vadd.f32 %v754_v52, %v153_v6  ;;  %v263_v39 = vmul.f32 %v782_v61, %v115_v2  ;;  %v314_v27 = vadd.f32 %v306_v30, %v250_v38  ;;  %v182_v28 = vmul.f32 %v763_v55, %v172_v26 }
  0xb3   :  { %v170_v53 = vmax.f32 %v162_v46, 0.0  ;;  %v280_v57 = vadd.f32 %v741_v48, %v262_v17  ;;  %v236_v42 = vmax.f32 %v228_v7, 0.0  ;;  %v226_v4 = vadd.f32 %v776_v59, %v216_v43  ;;  %v100_v7 = vpop.permute.xlu0 %99 }
  0xb4   :  { %v171_v36 = vmax.f32 %v163_v16, 0.0  ;;  %v227_v54 = vadd.f32 %v776_v59, %v217_v37  ;;  %v346_v32 = vadd.f32 %v338_v1, %v328_v45  ;;  %v281_v47 = vadd.f32 %v931_v8, %v263_v39  ;;  %v1140_v37 = vld [vmem:[#allocation18_spill] sm:$0xff] }
  0xb5   :  { %v180_v33 = vmul.f32 %v763_v55, %v170_v53  ;;  %v290_v44 = vadd.f32 %v794_v9, %v280_v57  ;;  %v300_v5 = vmax.f32 %v292_v15, 0.0  ;;  %v234_v63 = vmax.f32 %v226_v4, 0.0  ;;  %v1142_v57 = vld [vmem:[#allocation5_spill] sm:$0xff]  ;;  %v1144_v4 = vld [vmem:[#allocation6_spill] sm:$0xff] }
  0xb6   :  { %v181_v38 = vmul.f32 %v763_v55, %v171_v36  ;;  %v235_v25 = vmax.f32 %v227_v54, 0.0  ;;  %v190_v48 = vadd.f32 %v182_v28, %v748_v50  ;;  %v291_v23 = vadd.f32 %v794_v9, %v281_v47 }
  0xb7   :  { %v188_v20 = vadd.f32 %v180_v33, %v748_v50  ;;  %v326_v40 = vmul.f32 %v800_v11, %v114_v21  ;;  %v369_v1 = vmul.f32 %v812_v19, %v359_v29  ;;  %v370_v41 = vmul.f32 %v812_v19, %v360_v62 }
  0xb8   :  { %v246_v8 = vmul.f32 %v779_v60, %v236_v42  ;;  %v189_v26 = vadd.f32 %v181_v38, %v748_v50  ;;  %v356_v31 = vadd.f32 %v809_v18, %v346_v32  ;;  %v244_v3 = vmul.f32 %v779_v60, %v234_v63 }
  0xb9   :  { %v298_v14 = vmax.f32 %v290_v44, 0.0  ;;  %v327_v30 = vmul.f32 %v800_v11, %v115_v2  ;;  %v377_v6 = vadd.f32 %v369_v1, %v313_v12  ;;  %v378_v17 = vadd.f32 %v370_v41, %v314_v27  ;;  %v1141_v2 = vld [vmem:[#allocation7_spill] sm:$0xff] }
  0xba   :  { %v245_v21 = vmul.f32 %v779_v60, %v235_v25  ;;  %v299_v15 = vmax.f32 %v291_v23, 0.0  ;;  %v254_v29 = vadd.f32 %v246_v8, %v190_v48  ;;  %v310_v62 = vmul.f32 %v797_v10, %v300_v5  ;;  %v1146_v48 = vld [vmem:[#allocation17_spill] sm:$0xff]  ;;  %v1147_v41 = vld [vmem:[#allocation19_spill] sm:$0xff] }
  0xbb   :  { %v252_v45 = vadd.f32 %v244_v3, %v188_v20  ;;  %v344_v46 = vadd.f32 %v744_v49, %v326_v40  ;;  %v345_v43 = vadd.f32 %v936_v58, %v327_v30  ;;  %v102_v39 = vsel %vm101_vm6, %v1140_v37, %v100_v7 }
  0xbc   :  { %v253_v16 = vadd.f32 %v245_v21, %v189_v26  ;;  %v109_v12 = vsel %vm101_vm6, %v100_v7, %v1141_v2  ;;  %v364_v27 = vmax.f32 %v356_v31, 0.0  ;;  %v308_v28 = vmul.f32 %v797_v10, %v298_v14  ;;  %v1148_v14 = vld [vmem:[#allocation15_spill] sm:$0xff] }
  0xbd   :  { %v354_v53 = vadd.f32 %v809_v18, %v344_v46  ;;  %v110_v49 = vsel %vm726_vm4, %v1142_v57, %v109_v12  ;;  %v309_v36 = vmul.f32 %v797_v10, %v299_v15  ;;  %v355_v58 = vadd.f32 %v809_v18, %v345_v43 }
  0xbe   :  { %v117_v32 = vsel %vm771_vm7, %v1144_v4, %v102_v39  ;;  %v130_v13 = vmul.f32 %v751_v51, %v110_v49  ;;  %v318_v33 = vadd.f32 %v310_v62, %v254_v29  ;;  %v316_v47 = vadd.f32 %v308_v28, %v252_v45 }
  0xbf   :  { %v362_v44 = vmax.f32 %v354_v53, 0.0  ;;  %v137_v5 = vmul.f32 %v751_v51, %v117_v32  ;;  %v526_v38 = vclamps-f32 %v962_v22, 80.0  ;;  %v317_v63 = vadd.f32 %v309_v36, %v253_v16  ;;  %v1149_v51 = vld [vmem:[#allocation8_spill] sm:$0xff] }
  0xc0   :  { %v363_v25 = vmax.f32 %v355_v58, 0.0  ;;  %v148_v20 = vadd.f32 %v1146_v48, %v130_v13  ;;  %v524_v23 = vclamps-f32 %v377_v6, 80.0  ;;  %v374_v40 = vmul.f32 %v812_v19, %v364_v27 }
  0xc1   :  { %v372_v1 = vmul.f32 %v812_v19, %v362_v44  ;;  %v155_v8 = vadd.f32 %v1147_v41, %v137_v5  ;;  %v525_v26 = vclamps-f32 %v378_v17, 80.0  ;;  %v194_v3 = vmul.f32 %v766_v56, %v110_v49  ;;  %v1150_v17 = vld [vmem:[#allocation16_spill] sm:$0xff] }
  0xc2   :  { %v373_v31 = vmul.f32 %v812_v19, %v363_v25  ;;  %v204_v30 = vmul.f32 %v1149_v51, %v1148_v14  ;;  %v382_v22 = vadd.f32 %v374_v40, %v318_v33  ;;  %v158_v21 = vadd.f32 %v754_v52, %v148_v20 }
  0xc3   :  { %v380_v7 = vadd.f32 %v372_v1, %v316_v47  ;;  %v406_v15 = vmul.f32 1.442695, %v526_v38  ;;  %v165_v29 = vadd.f32 %v754_v52, %v155_v8  ;;  %v201_v62 = vmul.f32 %v766_v56, %v117_v32 }
  0xc4   :  { %v381_v6 = vadd.f32 %v373_v31, %v317_v63  ;;  %v402_v45 = vmul.f32 1.442695, %v524_v23  ;;  %v211_v16 = vmul.f32 %v1149_v51, %v1150_v17  ;;  %v404_v43 = vmul.f32 1.442695, %v525_v26 }
  0xc5   :  { %v527_v46 = vclamps-f32 %v380_v7, 80.0  ;;  %v212_v39 = vadd.f32 %v204_v30, %v194_v3  ;;  %v529_v2 = vclamps-f32 %v382_v22, 80.0  ;;  %v166_v27 = vmax.f32 %v158_v21, 0.0 }
  0xc6   :  { %v528_v37 = vclamps-f32 %v381_v6, 80.0  ;;  %534 = vpow2.f32 %v406_v15  ;;  %v173_v53 = vmax.f32 %v165_v29, 0.0  ;;  %v219_v57 = vadd.f32 %v211_v16, %v201_v62 }
  0xc7   :  { %v408_v12 = vmul.f32 1.442695, %v527_v46  ;;  %v268_v52 = vmul.f32 %v704_v34, %v1148_v14  ;;  %536 = vpow2.f32 %v402_v45  ;;  %v176_v56 = vmul.f32 %v763_v55, %v166_v27 }
  0xc8   :  { %v410_v28 = vmul.f32 1.442695, %v528_v37  ;;  %v332_v36 = vmul.f32 %v707_v35, %v1148_v14  ;;  %538 = vpow2.f32 %v404_v43  ;;  %v183_v58 = vmul.f32 %v763_v55, %v173_v53 }
  0xc9   :  { %v222_v4 = vadd.f32 %v776_v59, %v212_v39  ;;  %v412_v13 = vmul.f32 1.442695, %v529_v2  ;;  %540 = vpow2.f32 %v408_v12  ;;  %v229_v33 = vadd.f32 %v776_v59, %v219_v57 }
  0xca   :  { %v258_v47 = vmul.f32 %v782_v61, %v110_v49  ;;  %v275_v44 = vmul.f32 %v704_v34, %v1150_v17  ;;  %542 = vpow2.f32 %v410_v28  ;;  %v265_v38 = vmul.f32 %v782_v61, %v117_v32 }
  0xcb   :  { %v230_v5 = vmax.f32 %v222_v4, 0.0  ;;  %v184_v63 = vadd.f32 %v176_v56, %v748_v50  ;;  %v237_v25 = vmax.f32 %v229_v33, 0.0  ;;  %v322_v55 = vmul.f32 %v800_v11, %v110_v49 }
  0xcc   :  { %v276_v48 = vadd.f32 %v268_v52, %v258_v47  ;;  %v535_v20 = vpop.eup %534  ;;  %v339_v23 = vmul.f32 %v707_v35, %v1150_v17  ;;  %v191_v59 = vadd.f32 %v183_v58, %v748_v50  ;;  %v283_v40 = vadd.f32 %v275_v44, %v265_v38 }
  0xcd   :  { %v329_v1 = vmul.f32 %v800_v11, %v117_v32  ;;  %v537_v34 = vpop.eup %536  ;;  %544 = vpow2.f32 %v412_v13  ;;  %v240_v41 = vmul.f32 %v779_v60, %v230_v5  ;;  %v340_v8 = vadd.f32 %v332_v36, %v322_v55 }
  0xce   :  { %v286_v61 = vadd.f32 %v794_v9, %v276_v48  ;;  %v539_v26 = vpop.eup %538  ;;  %v247_v31 = vmul.f32 %v779_v60, %v237_v25  ;;  %v293_v49 = vadd.f32 %v794_v9, %v283_v40  ;;  %v419_v35 = vadd.f32 1.0, %v535_v20 }
  0xcf   :  { %v347_v3 = vadd.f32 %v339_v23, %v329_v1  ;;  %v541_v14 = vpop.eup %540  ;;  %v248_v51 = vadd.f32 %v240_v41, %v184_v63  ;;  %v350_v32 = vadd.f32 %v809_v18, %v340_v8  ;;  %v417_v21 = vadd.f32 1.0, %v537_v34 }
  0xd0   :  { %v294_v50 = vmax.f32 %v286_v61, 0.0  ;;  %v543_v30 = vpop.eup %542  ;;  %v255_v22 = vadd.f32 %v247_v31, %v191_v59  ;;  %v301_v11 = vmax.f32 %v293_v49, 0.0  ;;  %v418_v6 = vadd.f32 1.0, %v539_v26 }
  0xd1   :  { %v357_v7 = vadd.f32 %v809_v18, %v347_v3  ;;  %v358_v29 = vmax.f32 %v350_v32, 0.0  ;;  %546 = vrcp.f32 %v419_v35  ;;  %v420_v45 = vadd.f32 1.0, %v541_v14 }
  0xd2   :  { %v304_v15 = vmul.f32 %v797_v10, %v294_v50  ;;  %v311_v60 = vmul.f32 %v797_v10, %v301_v11  ;;  %v421_v17 = vadd.f32 1.0, %v543_v30  ;;  %548 = vrcp.f32 %v417_v21 }
  0xd3   :  { %v365_v9 = vmax.f32 %v357_v7, 0.0  ;;  %v545_v62 = vpop.eup %544  ;;  %v368_v43 = vmul.f32 %v812_v19, %v358_v29  ;;  %550 = vrcp.f32 %v418_v6  ;;  %vm499_vm0 = vcmask 1043456  }
  0xd4   :  { %v312_v46 = vadd.f32 %v304_v15, %v248_v51  ;;  %v319_v16 = vadd.f32 %v311_v60, %v255_v22  ;;  %v422_v18 = vadd.f32 1.0, %v545_v62  ;;  %552 = vrcp.f32 %v420_v45 }
  0xd5   :  { %v375_v37 = vmul.f32 %v812_v19, %v365_v9  ;;  %554 = vrcp.f32 %v421_v17 }
  0xd6   :  { %v376_v39 = vadd.f32 %v368_v43, %v312_v46  ;;  %556 = vrcp.f32 %v422_v18 }
  0xd7   :  { %v383_v2 = vadd.f32 %v375_v37, %v319_v16  ;;  %v547_v27 = vpop.eup %546 }
  0xd8   :  { %v523_v10 = vclamps-f32 %v376_v39, 80.0  ;;  %v549_v57 = vpop.eup %548  ;;  %v435_v19 = vmul.f32 %v547_v27, %v419_v35 }
  0xd9   :  { %v530_v12 = vclamps-f32 %v383_v2, 80.0  ;;  %v551_v52 = vpop.eup %550  ;;  %v433_v4 = vmul.f32 %v549_v57, %v417_v21 }
  0xda   :  { %v400_v28 = vmul.f32 1.442695, %v523_v10  ;;  %v553_v56 = vpop.eup %552  ;;  %v434_v13 = vmul.f32 %v551_v52, %v418_v6  ;;  %v443_v38 = vsub.f32 2.0, %v435_v19 }
  0xdb   :  { %v414_v53 = vmul.f32 1.442695, %v530_v12  ;;  %v555_v36 = vpop.eup %554  ;;  %v436_v33 = vmul.f32 %v553_v56, %v420_v45  ;;  %v441_v48 = vsub.f32 2.0, %v433_v4 }
  0xdc   :  { %558 = vpow2.f32 %v400_v28  ;;  %v557_v58 = vpop.eup %556  ;;  %v437_v47 = vmul.f32 %v555_v36, %v421_v17  ;;  %v442_v20 = vsub.f32 2.0, %v434_v13  ;;  %v451_v40 = vmul.f32 %v547_v27, %v443_v38 }
  0xdd   :  { %560 = vpow2.f32 %v414_v53  ;;  %v438_v63 = vmul.f32 %v557_v58, %v422_v18  ;;  %v444_v23 = vsub.f32 2.0, %v436_v33  ;;  %v449_v34 = vmul.f32 %v549_v57, %v441_v48 }
  0xde   :  { %v445_v59 = vsub.f32 2.0, %v437_v47  ;;  %v450_v41 = vmul.f32 %v551_v52, %v442_v20  ;;  %v459_v31 = vsub.f32 1.0, %v451_v40 }
  0xdf   :  { %v446_v1 = vsub.f32 2.0, %v438_v63  ;;  %v452_v61 = vmul.f32 %v553_v56, %v444_v23  ;;  %v457_v14 = vsub.f32 1.0, %v449_v34 }
  0xe0   :  { %v453_v8 = vmul.f32 %v555_v36, %v445_v59  ;;  %v458_v51 = vsub.f32 1.0, %v450_v41  ;;  %v467_v7 = vsel %vm722_vm3, %v451_v40, %v459_v31 }
  0xe1   :  { %v454_v49 = vmul.f32 %v557_v58, %v446_v1  ;;  %v460_v50 = vsub.f32 1.0, %v452_v61  ;;  %v465_v60 = vsel %vm730_vm5, %v449_v34, %v457_v14  ;;  %v482_v16 = vrot.slane %v467_v7, 5 }
  0xe2   :  { %v559_v44 = vpop.eup %558  ;;  %v461_v30 = vsub.f32 1.0, %v453_v8  ;;  %v466_v62 = vsel %vm718_vm2, %v450_v41, %v458_v51  ;;  %v480_v37 = vrot.slane %v465_v60, 7 }
  0xe3   :  { %v561_v5 = vpop.eup %560  ;;  %v416_v25 = vadd.f32 1.0, %v559_v44  ;;  %v462_v21 = vsub.f32 1.0, %v454_v49  ;;  %v468_v45 = vsel %vm679_vm1, %v452_v61, %v460_v50  ;;  %v481_v10 = vrot.slane %v466_v62, 6 }
  0xe4   :  { %v423_v55 = vadd.f32 1.0, %v561_v5  ;;  %v469_v46 = vsel %vm789_vm8, %v453_v8, %v461_v30  ;;  %v483_v12 = vrot.slane %v468_v45, 4 }
  0xe5   :  { %562 = vrcp.f32 %v416_v25  ;;  %v470_v39 = vsel %vm817_vm9, %v454_v49, %v462_v21  ;;  %v484_v27 = vrot.slane %v469_v46, 3  ;;  %v490_v52 = vsel %vm489_vm10, %v481_v10, %v482_v16 }
  0xe6   :  { %564 = vrcp.f32 %v423_v55  ;;  %v485_v28 = vrot.slane %v470_v39, 2 }
  0xe7   :  { %v494_v56 = vsel %vm493_vm12, %v483_v12, %v484_v27 }
  0xeb   :  { %v563_v26 = vpop.eup %562 }
  0xec   :  { %v565_v3 = vpop.eup %564  ;;  %v432_v35 = vmul.f32 %v563_v26, %v416_v25 }
  0xed   :  { %v439_v22 = vmul.f32 %v565_v3, %v423_v55 }
  0xee   :  { %v440_v11 = vsub.f32 2.0, %v432_v35 }
  0xef   :  { %v447_v15 = vsub.f32 2.0, %v439_v22 }
  0xf0   :  { %v448_v29 = vmul.f32 %v563_v26, %v440_v11 }
  0xf1   :  { %v455_v17 = vmul.f32 %v565_v3, %v447_v15 }
  0xf2   :  { %v456_v43 = vsub.f32 1.0, %v448_v29 }
  0xf3   :  { %v463_v2 = vsub.f32 1.0, %v455_v17 }
  0xf4   :  { %v464_v24 = vsel %vm726_vm4, %v448_v29, %v456_v43 }
  0xf5   :  { %v471_v0 = vsel %vm771_vm7, %v455_v17, %v463_v2  ;;  %v488_v57 = vsel %vm487_vm11, %v464_v24, %v480_v37 }
  0xf6   :  { %v486_v53 = vrot.slane %v471_v0, 1  ;;  %v492_v19 = vsel %vm491_vm13, %v488_v57, %v490_v52 }
  0xf8   :  { %v496_v36 = vsel %vm495_vm14, %v485_v28, %v486_v53 }
  0xf9   :  { %v498_v58 = vsel %vm497_vm15, %v494_v56, %v496_v36 }
  0xfa   :  { %v500_v4 = vsel %vm499_vm0, %v492_v19, %v498_v58 }
  0xfb   :  { %502 = vst [vmem:[%s1090_s2] sm:$0xff] %v500_v4 }

</bundles_post_ra>
